<compile_context>
chip_gen: v6e
topology: v6e:2x2x1
jax: 0.10.0
libtpu: 0.0.40
codegen_flags: <defaults>
</compile_context>

<pallas_src>
import functools

import jax
import jax.numpy as jnp
from jax import lax
from jax.experimental import pallas as pl
from jax.experimental.pallas import tpu as pltpu


def _cdiv(a, b):
    return -(-a // b)


def _round_up(x, m):
    return ((x + m - 1) // m) * m


def _choose_batch_tile(batch, batch_block):
    """Batch tile: multiple of 8, nearly-full last tile for ragged batches,
    and >=2 grid steps for large batches so v7x's 2 TensorCores both work."""
    n_tiles = max(1, _cdiv(batch, batch_block))
    if n_tiles == 1 and batch >= 1024:
        n_tiles = 2          # let the ("parallel",) grid axis megacore-shard
    return max(8, _round_up(_cdiv(batch, n_tiles), 8))


def _finance_kernel(desc_ref, amt_ref, wf_ref, wamt_ref, b_ref, out_ref, *, v_chunk):
    """One batch tile.

    desc_ref : (TB, S)        int32 token ids
    amt_ref  : (TB, 1)        f32 amounts
    wf_ref   : (V_pad, C_pad) fused weight (= E @ W_emb / S)
    wamt_ref : (1, C_pad)     f32 amount-column weight
    b_ref    : (1, C_pad)     f32 bias
    out_ref  : (TB, C_pad)    logits
    """
    ids = desc_ref[...]                               # (TB, S) int32
    TB, S = ids.shape
    V = wf_ref.shape[0]
    C_pad = out_ref.shape[1]

    acc = jnp.zeros((TB, C_pad), jnp.float32)
    # Static chunking over the vocab axis.  Loops fully unroll at trace time
    # (V, S, v_chunk are all static); compares run on the VPU, matmuls on the
    # MXU with f32 accumulation.
    for v0 in range(0, V, v_chunk):
        vc = min(v_chunk, V - v0)
        iota_v = lax.broadcasted_iota(jnp.int32, (TB, vc), 1) + v0
        cnt = jnp.zeros((TB, vc), jnp.int32)
        for s in range(S):
            cnt = cnt + (ids[:, s:s + 1] == iota_v).astype(jnp.int32)
        # counts <= S are exactly representable in bf16, so this cast is lossless.
        acc = acc + jnp.dot(cnt.astype(wf_ref.dtype), wf_ref[v0:v0 + vc, :],
                            preferred_element_type=jnp.float32)

    # Rank-1 amounts term as a VPU broadcast multiply (no K=1 MXU pass) + bias.
    out = acc + amt_ref[...] * wamt_ref[...] + b_ref[...]
    out_ref[...] = out.astype(out_ref.dtype)


def prepare_finance_params(emb_table, fc_weight, fc_bias, seq_len,
                           matmul_dtype=jnp.bfloat16, lane_pad=128):
    """One-time weight prep (hoisted out of the per-call path).

    Folds the embedding table and the 1/S mean into the classifier weight:
        W_fused = (E @ fc_weight[:, :D].T) / S        shape (V, C)
    pads the vocab (sublane) axis to a multiple of 8 and the category (lane)
    axis to a multiple of 128 so kernel stores are full, unmasked vst's.
    """
    V, D = emb_table.shape
    C = fc_weight.shape[0]
    assert fc_weight.shape[1] == D + 1

    w_t = fc_weight.T.astype(jnp.float32)              # (D+1, C)
    w_emb = w_t[:D, :]                                  # (D, C)
    w_amt = w_t[D:, :]                                  # (1, C)

    w_fused = (emb_table.astype(jnp.float32) @ w_emb) * (1.0 / seq_len)  # (V, C)

    V_pad = _round_up(V, 8)
    C_pad = _round_up(C, lane_pad)
    w_fused = jnp.pad(w_fused, ((0, V_pad - V), (0, C_pad - C))).astype(matmul_dtype)
    w_amt = jnp.pad(w_amt, ((0, 0), (0, C_pad - C)))
    bias = jnp.pad(fc_bias.astype(jnp.float32).reshape(1, C), ((0, 0), (0, C_pad - C)))

    return dict(w_fused=w_fused, w_amt=w_amt, bias=bias,
                num_categories=C, seq_len=seq_len)


def finance_categorizer(descriptions, amounts, params, *,
                        batch_block=1024, v_chunk=512, out_dtype=jnp.float32):
    """descriptions: (B, S) int token ids, amounts: (B, 1) f32 -> (B, C) logits."""
    w_fused, w_amt, bias = params["w_fused"], params["w_amt"], params["bias"]
    C = params["num_categories"]
    B, S = descriptions.shape
    assert S == params["seq_len"]
    V_pad, C_pad = w_fused.shape

    descriptions = descriptions.astype(jnp.int32)
    amounts = amounts.astype(jnp.float32)

    TB = _choose_batch_tile(B, batch_block)
    B_pad = _round_up(B, TB)
    if B_pad != B:
        descriptions = jnp.pad(descriptions, ((0, B_pad - B), (0, 0)))
        amounts = jnp.pad(amounts, ((0, B_pad - B), (0, 0)))

    grid = (B_pad // TB,)
    kernel = functools.partial(_finance_kernel, v_chunk=min(v_chunk, V_pad))
    # Grid-invariant operands: single-buffer (index_map is constant, so a
    # second pipeline buffer would be pure VMEM waste).
    resident = dict(pipeline_mode=pl.Buffered(1))

    out = pl.pallas_call(
        kernel,
        out_shape=jax.ShapeDtypeStruct((B_pad, C_pad), out_dtype),
        grid_spec=pltpu.PrefetchScalarGridSpec(
            num_scalar_prefetch=0,
            grid=grid,
            in_specs=[
                pl.BlockSpec((TB, S), lambda i: (i, 0)),                      # descriptions tile
                pl.BlockSpec((TB, 1), lambda i: (i, 0)),                      # amounts tile
                pl.BlockSpec((V_pad, C_pad), lambda i: (0, 0), **resident),   # fused weight
                pl.BlockSpec((1, C_pad), lambda i: (0, 0), **resident),       # amount weight row
                pl.BlockSpec((1, C_pad), lambda i: (0, 0), **resident),       # bias row
            ],
            out_specs=pl.BlockSpec((TB, C_pad), lambda i: (i, 0)),
        ),
        compiler_params=pltpu.CompilerParams(
            dimension_semantics=("parallel",),
            # Explicit scoped-VMEM limit: v5e's default is 16 MiB, which large
            # batch tiles / vocabularies would exceed; needed footprint here is
            # only a few MiB so this is headroom, not allocation.
            vmem_limit_bytes=64 * 1024 * 1024,
        ),
    )(descriptions, amounts, w_fused, w_amt, bias)

    # Drop padded rows / zero-padded logit columns here; never consume the
    # padded slab directly (a zero-padded column could win an argmax).
    return out[:B, :C]


def _reference(descriptions, amounts, emb_table, fc_weight, fc_bias):
    embedded = jnp.take(emb_table, descriptions, axis=0).mean(axis=1)   # (B, D)
    x = jnp.concatenate([embedded, amounts], axis=1)                    # (B, D+1)
    return x @ fc_weight.T + fc_bias


if __name__ == "__main__":
    vocab_size = 64
    embed_dim = 32
    num_categories = 8
    batch = 4
    seq = 8

    key = jax.random.PRNGKey(0)
    k_emb, k_w, k_b, k_ids, k_amt = jax.random.split(key, 5)

    # Deterministic parameter init (shapes match nn.Embedding / nn.Linear).
    emb_table = jax.random.normal(k_emb, (vocab_size, embed_dim), dtype=jnp.float32)
    fc_weight = jax.random.normal(k_w, (num_categories, embed_dim + 1), dtype=jnp.float32) * 0.1
    fc_bias = jax.random.normal(k_b, (num_categories,), dtype=jnp.float32) * 0.1

    descriptions = jax.random.randint(k_ids, (batch, seq), 0, vocab_size, dtype=jnp.int32)
    amounts = jax.random.uniform(k_amt, (batch, 1), dtype=jnp.float32) * 100.0

    ref = _reference(descriptions, amounts, emb_table, fc_weight, fc_bias)

    # f32 fused-weight path: exact up to f32 re-association, tight tolerance.
    params_f32 = prepare_finance_params(emb_table, fc_weight, fc_bias, seq,
                                        matmul_dtype=jnp.float32)
    out_f32 = jax.block_until_ready(
        finance_categorizer(descriptions, amounts, params_f32))
    assert out_f32.shape == (batch, num_categories)
    assert jnp.allclose(out_f32, ref, atol=1e-4, rtol=1e-4), (out_f32, ref)

    # bf16 MXU-operand + bf16-output path (native MXU rate, halved writeback):
    # counts are exact in bf16, only the fused weight and the final store round.
    params_bf16 = prepare_finance_params(emb_table, fc_weight, fc_bias, seq,
                                         matmul_dtype=jnp.bfloat16)
    out_bf16 = jax.block_until_ready(
        finance_categorizer(descriptions, amounts, params_bf16,
                            out_dtype=jnp.bfloat16))
    assert out_bf16.shape == (batch, num_categories)
    assert jnp.allclose(out_bf16.astype(jnp.float32), ref, atol=5e-1, rtol=5e-2), (out_bf16, ref)

    print("KERNEL_OK")
</pallas_src>

<mosaic_0001>
module attributes {stable_mosaic.version = 11 : i64} {
  func.func @_finance_kernel(%arg0: i32, %arg1: memref<8x8xi32, #tpu.memory_space<vmem>>, %arg2: memref<8x1xf32, #tpu.memory_space<vmem>>, %arg3: memref<64x128xf32, #tpu.memory_space<vmem>>, %arg4: memref<1x128xf32, #tpu.memory_space<vmem>>, %arg5: memref<1x128xf32, #tpu.memory_space<vmem>>, %arg6: memref<8x128xf32, #tpu.memory_space<vmem>>) attributes {dimension_semantics = [#tpu.dimension_semantics<parallel>], iteration_bounds = array<i64: 1>, scalar_prefetch = 0 : i64, scratch_operands = 0 : i64, tpu.core_type = #tpu.core_type<tc>, window_params = [{transform_indices = @transform_0, window_bounds = array<i64: 8, 8>}, {transform_indices = @transform_1, window_bounds = array<i64: 8, 1>}, {pipeline_mode = #tpu.pipeline_mode<synchronous>, transform_indices = @transform_2, window_bounds = array<i64: 64, 128>}, {pipeline_mode = #tpu.pipeline_mode<synchronous>, transform_indices = @transform_3, window_bounds = array<i64: 1, 128>}, {pipeline_mode = #tpu.pipeline_mode<synchronous>, transform_indices = @transform_4, window_bounds = array<i64: 1, 128>}, {transform_indices = @transform_5, window_bounds = array<i64: 8, 128>}]} {
    %c0 = arith.constant 0 : index
    %c0_0 = arith.constant 0 : index
    %0 = vector.load %arg1[%c0, %c0_0] : memref<8x8xi32, #tpu.memory_space<vmem>>, vector<8x8xi32>
    %cst = arith.constant 0.000000e+00 : f32
    %1 = vector.broadcast %cst : f32 to vector<8x128xf32>
    %2 = tpu.iota {dimensions = array<i32: 1>} : vector<8x64xi32>
    %c0_i32 = arith.constant 0 : i32
    %3 = vector.broadcast %c0_i32 : i32 to vector<8x64xi32>
    %4 = arith.addi %2, %3 : vector<8x64xi32>
    %c0_i32_1 = arith.constant 0 : i32
    %5 = vector.broadcast %c0_i32_1 : i32 to vector<8x64xi32>
    %6 = vector.extract_strided_slice %0 {offsets = [0, 0], sizes = [8, 1], strides = [1, 1]} : vector<8x8xi32> to vector<8x1xi32>
    %7 = vector.broadcast %6 : vector<8x1xi32> to vector<8x64xi32>
    %8 = arith.cmpi eq, %7, %4 : vector<8x64xi32>
    %9 = arith.extui %8 : vector<8x64xi1> to vector<8x64xi32>
    %10 = arith.addi %5, %9 : vector<8x64xi32>
    %11 = vector.extract_strided_slice %0 {offsets = [0, 1], sizes = [8, 1], strides = [1, 1]} : vector<8x8xi32> to vector<8x1xi32>
    %12 = vector.broadcast %11 : vector<8x1xi32> to vector<8x64xi32>
    %13 = arith.cmpi eq, %12, %4 : vector<8x64xi32>
    %14 = arith.extui %13 : vector<8x64xi1> to vector<8x64xi32>
    %15 = arith.addi %10, %14 : vector<8x64xi32>
    %16 = vector.extract_strided_slice %0 {offsets = [0, 2], sizes = [8, 1], strides = [1, 1]} : vector<8x8xi32> to vector<8x1xi32>
    %17 = vector.broadcast %16 : vector<8x1xi32> to vector<8x64xi32>
    %18 = arith.cmpi eq, %17, %4 : vector<8x64xi32>
    %19 = arith.extui %18 : vector<8x64xi1> to vector<8x64xi32>
    %20 = arith.addi %15, %19 : vector<8x64xi32>
    %21 = vector.extract_strided_slice %0 {offsets = [0, 3], sizes = [8, 1], strides = [1, 1]} : vector<8x8xi32> to vector<8x1xi32>
    %22 = vector.broadcast %21 : vector<8x1xi32> to vector<8x64xi32>
    %23 = arith.cmpi eq, %22, %4 : vector<8x64xi32>
    %24 = arith.extui %23 : vector<8x64xi1> to vector<8x64xi32>
    %25 = arith.addi %20, %24 : vector<8x64xi32>
    %26 = vector.extract_strided_slice %0 {offsets = [0, 4], sizes = [8, 1], strides = [1, 1]} : vector<8x8xi32> to vector<8x1xi32>
    %27 = vector.broadcast %26 : vector<8x1xi32> to vector<8x64xi32>
    %28 = arith.cmpi eq, %27, %4 : vector<8x64xi32>
    %29 = arith.extui %28 : vector<8x64xi1> to vector<8x64xi32>
    %30 = arith.addi %25, %29 : vector<8x64xi32>
    %31 = vector.extract_strided_slice %0 {offsets = [0, 5], sizes = [8, 1], strides = [1, 1]} : vector<8x8xi32> to vector<8x1xi32>
    %32 = vector.broadcast %31 : vector<8x1xi32> to vector<8x64xi32>
    %33 = arith.cmpi eq, %32, %4 : vector<8x64xi32>
    %34 = arith.extui %33 : vector<8x64xi1> to vector<8x64xi32>
    %35 = arith.addi %30, %34 : vector<8x64xi32>
    %36 = vector.extract_strided_slice %0 {offsets = [0, 6], sizes = [8, 1], strides = [1, 1]} : vector<8x8xi32> to vector<8x1xi32>
    %37 = vector.broadcast %36 : vector<8x1xi32> to vector<8x64xi32>
    %38 = arith.cmpi eq, %37, %4 : vector<8x64xi32>
    %39 = arith.extui %38 : vector<8x64xi1> to vector<8x64xi32>
    %40 = arith.addi %35, %39 : vector<8x64xi32>
    %41 = vector.extract_strided_slice %0 {offsets = [0, 7], sizes = [8, 1], strides = [1, 1]} : vector<8x8xi32> to vector<8x1xi32>
    %42 = vector.broadcast %41 : vector<8x1xi32> to vector<8x64xi32>
    %43 = arith.cmpi eq, %42, %4 : vector<8x64xi32>
    %44 = arith.extui %43 : vector<8x64xi1> to vector<8x64xi32>
    %45 = arith.addi %40, %44 : vector<8x64xi32>
    %46 = arith.sitofp %45 : vector<8x64xi32> to vector<8x64xf32>
    %c0_2 = arith.constant 0 : index
    %c0_3 = arith.constant 0 : index
    %47 = vector.load %arg3[%c0_2, %c0_3] : memref<64x128xf32, #tpu.memory_space<vmem>>, vector<64x128xf32>
    %cst_4 = arith.constant dense<0.000000e+00> : vector<8x128xf32>
    %48 = tpu.matmul %46, %47, %cst_4 {dimension_numbers = #tpu.dot_dimension_numbers<[1], [0], [0], [1], [0, 0, 1, 1], [], []>} : vector<8x64xf32>, vector<64x128xf32>, vector<8x128xf32> -> vector<8x128xf32>
    %49 = arith.addf %1, %48 : vector<8x128xf32>
    %c0_5 = arith.constant 0 : index
    %c0_6 = arith.constant 0 : index
    %50 = vector.load %arg2[%c0_5, %c0_6] : memref<8x1xf32, #tpu.memory_space<vmem>>, vector<8x1xf32>
    %c0_7 = arith.constant 0 : index
    %c0_8 = arith.constant 0 : index
    %51 = vector.load %arg4[%c0_7, %c0_8] : memref<1x128xf32, #tpu.memory_space<vmem>>, vector<1x128xf32>
    %52 = vector.broadcast %50 : vector<8x1xf32> to vector<8x128xf32>
    %53 = vector.broadcast %51 : vector<1x128xf32> to vector<8x128xf32>
    %54 = arith.mulf %52, %53 : vector<8x128xf32>
    %55 = arith.addf %49, %54 : vector<8x128xf32>
    %c0_9 = arith.constant 0 : index
    %c0_10 = arith.constant 0 : index
    %56 = vector.load %arg5[%c0_9, %c0_10] : memref<1x128xf32, #tpu.memory_space<vmem>>, vector<1x128xf32>
    %57 = vector.broadcast %56 : vector<1x128xf32> to vector<8x128xf32>
    %58 = arith.addf %55, %57 : vector<8x128xf32>
    %c0_11 = arith.constant 0 : index
    %c0_12 = arith.constant 0 : index
    %59 = vector.load %arg6[%c0_11, %c0_12] : memref<8x128xf32, #tpu.memory_space<vmem>>, vector<8x128xf32>
    tpu.vector_store %arg6[%c0_11, %c0_12], %58 {strides = array<i32>} : memref<8x128xf32, #tpu.memory_space<vmem>>, vector<8x128xf32>,
    return
  }
  func.func @transform_0(%arg0: i32) -> (i32, i32) {
    %c0_i32 = arith.constant 0 : i32
    %c0_i32_0 = arith.constant 0 : i32
    return %arg0, %c0_i32 : i32, i32
  }
  func.func @transform_1(%arg0: i32) -> (i32, i32) {
    %c0_i32 = arith.constant 0 : i32
    %c0_i32_0 = arith.constant 0 : i32
    return %arg0, %c0_i32 : i32, i32
  }
  func.func @transform_2(%arg0: i32) -> (i32, i32) {
    %c0_i32 = arith.constant 0 : i32
    %c0_i32_0 = arith.constant 0 : i32
    %c0_i32_1 = arith.constant 0 : i32
    return %c0_i32, %c0_i32_0 : i32, i32
  }
  func.func @transform_3(%arg0: i32) -> (i32, i32) {
    %c0_i32 = arith.constant 0 : i32
    %c0_i32_0 = arith.constant 0 : i32
    %c0_i32_1 = arith.constant 0 : i32
    return %c0_i32, %c0_i32_0 : i32, i32
  }
  func.func @transform_4(%arg0: i32) -> (i32, i32) {
    %c0_i32 = arith.constant 0 : i32
    %c0_i32_0 = arith.constant 0 : i32
    %c0_i32_1 = arith.constant 0 : i32
    return %c0_i32, %c0_i32_0 : i32, i32
  }
  func.func @transform_5(%arg0: i32) -> (i32, i32) {
    %c0_i32 = arith.constant 0 : i32
    %c0_i32_0 = arith.constant 0 : i32
    return %arg0, %c0_i32 : i32, i32
  }
}

</mosaic_0001>

<bundles_post_ra>
// kernel: tpu_custom_call.1
= control target key start
LH: loop header
LB: loop body
LE: loop exit
PB: predicated region body
PF: predicated region fallthrough
CT: control target
= control target key end

     0   :  { %10 = vsyncpa [#allocation3], 0  ;;  %s376_s0 = inlined_call_operand.vmem [shape: s32[8,8], index: 0, kind: input, shape index: {}]   ;;  %s377_s1 = inlined_call_operand.vmem [shape: f32[8,1], index: 1, kind: input, shape index: {}]   ;;  %s378_s2 = inlined_call_operand.hbm [shape: f32[64,128], index: 2, kind: input, shape index: {}]   ;;  %s379_s3 = inlined_call_operand.vmem [shape: f32[1,128], index: 3, kind: input, shape index: {}]   ;;  %s380_s4 = inlined_call_operand.vmem [shape: f32[1,128], index: 4, kind: input, shape index: {}]   ;;  %s381_s5 = inlined_call_operand.hbm [shape: f32[8,128], index: 5, kind: output, shape index: {}]  }
   0x1   :  { %11 = vsyncpa [#allocation4], 0  ;;  %s304_s18 = smov [#allocation2]  }
   0x2   :  { %s21_s19 = sshll.u32 %s304_s18, 4  ;;  %s22_s19 = int_to_ptr.vmem [resolvable:$true] %s21_s19 }
   0x3   :  { %s268_s20 = scalar_lea.vmem %s22_s19, 1024  ;;  %p273_p1 = scmp.lt.s32.totalorder %s22_s19, %s22_s19 }
   0x4   :  { %p269_p0 = scmp.ne.s32.totalorder %s22_s19, %s268_s20  ;;  %p274_p2 = scmp.lt.s32.totalorder %s268_s20, %s268_s20 }
   0x6   :  { %p275_p3 = por %p274_p2, %p273_p1 }
   0x8   :  { %p276_p4 = pnand %p275_p3, %p269_p0 }
   0xa   :  { %279 = shalt.err (!%p276_p4)
}
   0xb   :  { %s305_s21 = smov 128   ;;  %s306_s22 = smov 8  }
   0xc   :  { %27 = dma.hbm_to_vmem [thread:$0]  %s378_s2, 1024, %s22_s19, [#allocation3], %s305_s21, %s305_s21, %s306_s22  }
   0xd   :  { %300 = dma.done.wait [#allocation3], 1024  }
   0xe   :  { %301 = vsyncadd [#allocation3], 4294966272  ;;  %v307_v0 = vmov 2   ;;  %v308_v1 = vmov 0   ;;  %v35_v2 = vld [vmem:[%s376_s0] sm:$0xff]  ;;  %v309_v3 = vmov 3   ;;  %v36_v19 = vlaneseq }
   0xf   :  { %253 = vset.pattern.permute.xlu1 %v307_v0  ;;  %251 = vset.pattern.permute.xlu0 %v308_v1  ;;  %v310_v4 = vmov 1   ;;  %v311_v5 = vmov 0.0   ;;  %v93_v6 = vld [vmem:[#allocation2 + $0x38] sm:$0xff]  ;;  %v92_v7 = vld [vmem:[#allocation2 + $0x30] sm:$0xff]  ;;  %v312_v8 = vmov 4   ;;  %v313_v9 = vmov 5  }
  0x10   :  { %50 = vperm.xlu1 %253, %v35_v2   ;;  %39 = vperm.xlu0 %251, %v35_v2   ;;  %v91_v10 = vld [vmem:[#allocation2 + $0x28] sm:$0xff]  ;;  %v90_v11 = vld [vmem:[#allocation2 + $0x20] sm:$0xff]  ;;  %v314_v12 = vmov 6   ;;  %v89_v13 = vld [vmem:[#allocation2 + $0x18] sm:$0xff]  ;;  %v315_v16 = vmov 7   ;;  %vm316_vm0 = vmmov 0  }
  0x11   :  { %218 = vmatprep.subr.mxu0 %v311_v5  ;;  %v88_v14 = vld [vmem:[#allocation2 + $0x10] sm:$0xff]  ;;  %v87_v15 = vld [vmem:[#allocation2 + $0x8] sm:$0xff]  ;;  %v86_v17 = vld [vmem:[#allocation2] sm:$0xff]  ;;  %234 = vmatprep.mubr.msk.f32.mxu0 %vm316_vm0, %v311_v5  ;;  %v37_v22 = vand.u32 127, %v36_v19  ;;  %vm108_vm9 = vcmask 523264   ;;  %s317_s30 = smov [#allocation5]  }
  0x12   :  { %219 = vmatpush3.msra.mxu0 %v93_v6  ;;  %v94_v18 = vld [vmem:[%s377_s1] sm:$0xff]  ;;  %s197_s6 = sshll.u32 %s317_s30, 4  ;;  %s198_s6 = int_to_ptr.vmem [resolvable:$true] %s197_s6 }
  0x13   :  { %220 = vmatprep.subr.mxu0 %v311_v5  ;;  %v206_v45 = vld [vmem:[%s379_s3] ss:$0 sm:$0xff]  ;;  %s280_s7 = scalar_lea.vmem %s198_s6, 128  ;;  %p285_p6 = scmp.lt.s32.totalorder %s198_s6, %s198_s6 }
  0x14   :  { %254 = vset.pattern.permute.xlu1 %v309_v3  ;;  %252 = vset.pattern.permute.xlu0 %v310_v4  ;;  %v208_v49 = vld [vmem:[%s380_s4] ss:$0 sm:$0xff]  ;;  %p281_p5 = scmp.ne.s32.totalorder %s198_s6, %s280_s7  ;;  %p286_p7 = scmp.lt.s32.totalorder %s280_s7, %s280_s7 }
  0x15   :  { %56 = vperm.xlu1 %254, %v35_v2   ;;  %44 = vperm.xlu0 %252, %v35_v2  }
  0x16   :  { %221 = vmatpush3.msra.mxu0 %v92_v7  ;;  %p287_p8 = por %p286_p7, %p285_p6 }
  0x17   :  { %222 = vmatprep.subr.mxu0 %v311_v5 }
  0x18   :  { %223 = vmatpush3.msra.mxu0 %v91_v10  ;;  %p288_p9 = pnand %p287_p8, %p281_p5 }
  0x19   :  { %255 = vset.pattern.permute.xlu1 %v312_v8  ;;  %256 = vset.pattern.permute.xlu0 %v313_v9 }
  0x1a   :  { %62 = vperm.xlu1 %255, %v35_v2   ;;  %68 = vperm.xlu0 %256, %v35_v2  }
  0x1b   :  { %224 = vmatprep.subr.mxu0 %v311_v5 }
  0x1c   :  { %225 = vmatpush3.msra.mxu0 %v90_v11 }
  0x1d   :  { %226 = vmatprep.subr.mxu0 %v311_v5 }
  0x1e   :  { %257 = vset.pattern.permute.xlu1 %v314_v12  ;;  %259 = vset.pattern.permute.xlu0 %v308_v1 }
  0x1f   :  { %74 = vperm.xlu1 %257, %v35_v2   ;;  %227 = vmatpush3.msra.mxu0 %v89_v13 }
  0x20   :  { %228 = vmatprep.subr.mxu0 %v311_v5  ;;  %98 = vperm.xlu0 %259, %v94_v18  }
  0x21   :  { %229 = vmatpush3.msra.mxu0 %v88_v14 }
  0x22   :  { %230 = vmatprep.subr.mxu0 %v311_v5 }
  0x23   :  { %258 = vset.pattern.permute.xlu1 %v315_v16  ;;  %231 = vmatpush3.msra.mxu0 %v87_v15 }
  0x24   :  { %80 = vperm.xlu1 %258, %v35_v2   ;;  %232 = vmatprep.subr.mxu0 %v311_v5 }
  0x25   :  { %233 = vmatpush3.msra.mxu0 %v86_v17 }
  0x8b   :  { %v51_v20 = vpop.permute.xlu1 %50  ;;  %v40_v21 = vpop.permute.xlu0 %39 }
  0x8c   :  { %vm41_vm1 = vcmp.eq.s32.totalorder %v40_v21, %v37_v22  ;;  %vm52_vm2 = vcmp.eq.s32.totalorder %v51_v20, %v37_v22 }
  0x8d   :  { %v42_v25 = vsel %vm41_vm1, 1, %v308_v1  ;;  %v53_v28 = vsel %vm52_vm2, 1, %v308_v1 }
  0x90   :  { %v57_v23 = vpop.permute.xlu1 %56  ;;  %v45_v24 = vpop.permute.xlu0 %44 }
  0x91   :  { %vm46_vm3 = vcmp.eq.s32.totalorder %v45_v24, %v37_v22  ;;  %vm58_vm4 = vcmp.eq.s32.totalorder %v57_v23, %v37_v22 }
  0x92   :  { %v47_v26 = vsel %vm46_vm3, 1, %v308_v1  ;;  %v59_v32 = vsel %vm58_vm4, 1, %v308_v1 }
  0x93   :  { %v48_v27 = vadd.s32 %v47_v26, %v42_v25 }
  0x95   :  { %v54_v29 = vadd.s32 %v53_v28, %v48_v27  ;;  %v63_v30 = vpop.permute.xlu1 %62  ;;  %v69_v31 = vpop.permute.xlu0 %68 }
  0x96   :  { %vm64_vm5 = vcmp.eq.s32.totalorder %v63_v30, %v37_v22  ;;  %vm70_vm6 = vcmp.eq.s32.totalorder %v69_v31, %v37_v22 }
  0x97   :  { %v60_v33 = vadd.s32 %v59_v32, %v54_v29  ;;  %v65_v34 = vsel %vm64_vm5, 1, %v308_v1  ;;  %v71_v36 = vsel %vm70_vm6, 1, %v308_v1 }
  0x99   :  { %v66_v35 = vadd.s32 %v65_v34, %v60_v33 }
  0x9a   :  { %v75_v37 = vpop.permute.xlu1 %74 }
  0x9b   :  { %vm76_vm7 = vcmp.eq.s32.totalorder %v75_v37, %v37_v22  ;;  %v72_v38 = vadd.s32 %v71_v36, %v66_v35  ;;  %v99_v46 = vpop.permute.xlu0 %98 }
  0x9c   :  { %v77_v39 = vsel %vm76_vm7, 1, %v308_v1  ;;  %v107_v47 = vmul.f32 %v206_v45, %v99_v46 }
  0x9d   :  { %v78_v41 = vadd.s32 %v77_v39, %v72_v38 }
  0x9f   :  { %v81_v40 = vpop.permute.xlu1 %80 }
  0xa0   :  { %vm82_vm8 = vcmp.eq.s32.totalorder %v81_v40, %v37_v22 }
  0xa1   :  { %v83_v42 = vsel %vm82_vm8, 1, %v308_v1 }
  0xa2   :  { %v84_v43 = vadd.s32 %v83_v42, %v78_v41 }
  0xa4   :  { %v85_v44 = vcvt.s32.f32 %v84_v43 }
  0xa6   :  { %235 = vmatmul.mubr.msk.f32.vlgmr.msra.gmra.mxu0 %vm108_vm9, %v85_v44 }
 0x166   :  { %v178_v48 = vpop.f32.mrf.mxu0 }
 0x167   :  { %v179_v50 = vadd.f32 %v178_v48, %v107_v47 }
 0x168   :  { %v236_v51 = vpop.f32.mrf.mxu0 }
 0x169   :  { %v189_v52 = vadd.f32 %v208_v49, %v179_v50 }
 0x16b   :  { %190 = vst [vmem:[#allocation5] sm:$0xff] %v189_v52 }
 0x16c   :  { %291 = shalt.err (!%p288_p9)
}
 0x16d   :  { %200 = dma.vmem_to_hbm [thread:$0]  %s198_s6, 128, %s381_s5, [#allocation4]  }
 0x16e   :  { %302 = dma.done.wait [#allocation4], 128  }
 0x16f   :  { %303 = vsyncadd [#allocation4], 4294967168 }
 0x170   :  { %204 = vsyncpa [#allocation3], 1 }
 0x171   :  { %205 = vsyncpa [#allocation4], 1 }

</bundles_post_ra>
